<compile_context>
chip_gen: v6e
topology: v6e:2x2x1
jax: 0.10.0
libtpu: 0.0.40
codegen_flags: <defaults>
</compile_context>

<pallas_src>
import functools
import math

import jax
import jax.numpy as jnp
from jax.experimental import pallas as pl
from jax.experimental.pallas import tpu as pltpu


def signal_encoder_kernel(x_ref, w1_ref, b1_ref, w2_ref, b2_ref,
                          wh_ref, bh_ref, mask_ref, out_ref):
    # fc_hidden: Linear -> ReLU -> Linear -> ReLU.
    # Normalization (x-mean)/std is pre-folded into w1/b1 by the wrapper.
    # bf16 operands, f32 accumulation; bias/ReLU/exp stay f32.
    h = jnp.dot(x_ref[...], w1_ref[...], preferred_element_type=jnp.float32)
    h = jnp.maximum(h + b1_ref[...], 0.0)
    h = jnp.dot(h.astype(w2_ref.dtype), w2_ref[...],
                preferred_element_type=jnp.float32)
    h = jnp.maximum(h + b2_ref[...], 0.0)

    # Fused heads: cols [0, L) = mu, [L, 2L) = 0.5*logvar (0.5 baked into wh/bh),
    # remaining cols are zero padding (lane-dense output store).
    raw = jnp.dot(h.astype(wh_ref.dtype), wh_ref[...],
                  preferred_element_type=jnp.float32) + bh_ref[...]
    is_sigma = mask_ref[...] != 0.0          # precomputed (1, head_pad) mask
    out_ref[...] = jnp.where(is_sigma, jnp.exp(raw), raw).astype(out_ref.dtype)


@functools.lru_cache(maxsize=None)
def _buffered_one_supported():
    """Probe (once, eagerly) whether pipeline_mode=pl.Buffered(1) works here."""
    try:
        def k(x_ref, o_ref):
            o_ref[...] = x_ref[...]
        f = pl.pallas_call(
            k,
            out_shape=jax.ShapeDtypeStruct((8, 128), jnp.float32),
            grid=(1,),
            in_specs=[pl.BlockSpec((8, 128), lambda i: (0, 0),
                                   pipeline_mode=pl.Buffered(1))],
            out_specs=pl.BlockSpec((8, 128), lambda i: (0, 0)),
        )
        jax.block_until_ready(f(jnp.zeros((8, 128), jnp.float32)))
        return True
    except Exception:
        return False


@functools.lru_cache(maxsize=None)
def _num_tensorcores():
    """Best-effort TensorCore-per-chip count (1 on v5e/v6e, 2 on v7x)."""
    try:
        info = pltpu.get_tpu_info()
        for attr in ("num_cores", "tensorcores_per_chip", "num_tensorcores",
                     "cores_per_chip", "core_count"):
            v = getattr(info, attr, None)
            if isinstance(v, int) and v > 0:
                return v
    except Exception:
        pass
    return 1


def _choose_block_n(N, num_cores, bytes_per_row, vmem_budget=8 << 20):
    """Batch tile: whole batch on single-TC chips, balanced >=num_cores steps
    on multi-TC chips, capped by a rough per-tile VMEM budget."""
    cap = max(8, min(2048, vmem_budget // max(bytes_per_row, 1)))
    if num_cores <= 1:
        if N <= cap:
            return N
        for cand in (2048, 1024, 512, 256, 128, 64, 32, 16, 8):
            if cand <= cap and N % cand == 0:
                return cand
        return N
    for cand in (2048, 1024, 512, 256, 128, 64, 32, 16, 8):
        if cand <= cap and N % cand == 0 and (N // cand) % num_cores == 0:
            return cand
    return N


def make_signal_encoder(params, mean, std, *, latent_dim=None,
                        compute_dtype=jnp.bfloat16, block_n=None):
    """One-time (hoisted) weight preparation + jitted fused forward.

    Returns forward(x: (N,C,H,W) f32) -> (mu, sigma), each (N, latent_dim) f32.
    """
    if latent_dim is None:
        latent_dim = params["wmu"].shape[1]
    in_dim, hidden_dim = params["w1"].shape

    mean1 = jnp.asarray(mean, jnp.float32).reshape(in_dim)
    std1 = jnp.asarray(std, jnp.float32).reshape(in_dim)

    # ---- fold normalization into the first linear layer (done ONCE) --------
    # NOTE: trades a little precision for very small std / large mean against
    # removing the per-call VPU normalize and the mean/std loads.
    inv_std = 1.0 / std1
    w1 = (params["w1"] * inv_std[:, None]).astype(compute_dtype)
    b1 = (params["b1"] - (mean1 * inv_std) @ params["w1"]
          ).astype(jnp.float32).reshape(1, hidden_dim)

    w2 = params["w2"].astype(compute_dtype)
    b2 = params["b2"].astype(jnp.float32).reshape(1, hidden_dim)

    # ---- fuse mu / 0.5*logvar heads into one lane-dense padded matmul ------
    head_pad = max(128, pl.cdiv(2 * latent_dim, 128) * 128)
    wh = jnp.zeros((hidden_dim, head_pad), jnp.float32)
    wh = wh.at[:, :latent_dim].set(params["wmu"])
    wh = wh.at[:, latent_dim:2 * latent_dim].set(0.5 * params["wsig"])  # bake 0.5
    wh = wh.astype(compute_dtype)
    bh = jnp.zeros((1, head_pad), jnp.float32)
    bh = bh.at[0, :latent_dim].set(params["bmu"])
    bh = bh.at[0, latent_dim:2 * latent_dim].set(0.5 * params["bsig"])
    col = jnp.arange(head_pad)
    sig_mask = ((col >= latent_dim) & (col < 2 * latent_dim)
                ).astype(jnp.float32).reshape(1, head_pad)

    # Materialize the folded/padded constants now (out of the hot path).
    w1, b1, w2, b2, wh, bh, sig_mask = jax.block_until_ready(
        (w1, b1, w2, b2, wh, bh, sig_mask))

    single_buffer = _buffered_one_supported()
    num_cores = _num_tensorcores()
    weight_bytes = sum(int(a.size) * a.dtype.itemsize
                       for a in (w1, b1, w2, b2, wh, bh, sig_mask))
    x_itemsize = jnp.dtype(compute_dtype).itemsize

    def rep(shape):
        # Replicated (VMEM-resident) parameter block; single-buffer if possible.
        if single_buffer:
            return pl.BlockSpec(shape, lambda i: (0, 0),
                                pipeline_mode=pl.Buffered(1))
        return pl.BlockSpec(shape, lambda i: (0, 0))

    def forward(x):
        N = x.shape[0]
        x2 = x.reshape(N, in_dim).astype(compute_dtype)

        bytes_per_row = 2 * (in_dim * x_itemsize + head_pad * 4)  # dbl-buffered
        bn = block_n if block_n is not None else _choose_block_n(
            N, num_cores, bytes_per_row)
        assert N % bn == 0
        grid = (N // bn,)

        # Rough VMEM footprint; only pass an explicit limit when it exceeds
        # the common scoped default.
        est = (2 * bn * (in_dim * x_itemsize + head_pad * 4)
               + (1 if single_buffer else 2) * weight_bytes + (1 << 20))
        vmem_limit = int(min(est * 3 // 2, 128 << 20)) if est > (12 << 20) else None

        # TODO(synk): for large in_dim/hidden_dim (weights approaching v7x's
        # 64 MiB VMEM) add a K-tiled "arbitrary" grid axis with an f32 VMEM
        # accumulator (pl.when init/finalize) instead of resident full weights.
        fused = pl.pallas_call(
            signal_encoder_kernel,
            out_shape=jax.ShapeDtypeStruct((N, head_pad), jnp.float32),
            grid=grid,
            in_specs=[
                pl.BlockSpec((bn, in_dim), lambda i: (i, 0)),  # x
                rep((in_dim, hidden_dim)),                     # W1 (norm folded)
                rep((1, hidden_dim)),                          # b1 (norm folded)
                rep((hidden_dim, hidden_dim)),                 # W2
                rep((1, hidden_dim)),                          # b2
                rep((hidden_dim, head_pad)),                   # fused head W
                rep((1, head_pad)),                            # fused head b
                rep((1, head_pad)),                            # sigma-column mask
            ],
            out_specs=pl.BlockSpec((bn, head_pad), lambda i: (i, 0)),
            compiler_params=pltpu.CompilerParams(
                dimension_semantics=("parallel",),
                vmem_limit_bytes=vmem_limit),
        )(x2, w1, b1, w2, b2, wh, bh, sig_mask)

        # TODO(synk): these lane-narrow slices are cheap here; keep mu/sigma
        # packed (or emit bf16 output) for the consumer if they show up in traces.
        mu = fused[:, :latent_dim]
        sigma = fused[:, latent_dim:2 * latent_dim]
        return mu, sigma

    return jax.jit(forward)


def init_params(key, in_dim, hidden_dim, latent_dim):
    """Deterministic init mimicking torch.nn.Linear (U[-1/sqrt(fan_in), 1/sqrt(fan_in)]).
    Weights stored as (in_features, out_features) for x @ W."""
    ks = jax.random.split(key, 8)

    def lin(kw, kb, fan_in, fan_out):
        bound = 1.0 / math.sqrt(fan_in)
        w = jax.random.uniform(kw, (fan_in, fan_out), jnp.float32, -bound, bound)
        b = jax.random.uniform(kb, (fan_out,), jnp.float32, -bound, bound)
        return w, b

    w1, b1 = lin(ks[0], ks[1], in_dim, hidden_dim)
    w2, b2 = lin(ks[2], ks[3], hidden_dim, hidden_dim)
    wmu, bmu = lin(ks[4], ks[5], hidden_dim, latent_dim)
    wsig, bsig = lin(ks[6], ks[7], hidden_dim, latent_dim)
    return dict(w1=w1, b1=b1, w2=w2, b2=b2,
                wmu=wmu, bmu=bmu, wsig=wsig, bsig=bsig)


def reference_forward(x, mean, std, params):
    """Pure-JAX f32 reference matching the PyTorch forward (un-folded params)."""
    N = x.shape[0]
    in_dim = x.shape[1] * x.shape[2] * x.shape[3]
    xn = ((x - mean[None]) / std[None]).reshape(N, in_dim)
    h = jnp.maximum(xn @ params["w1"] + params["b1"], 0.0)
    h = jnp.maximum(h @ params["w2"] + params["b2"], 0.0)
    mu = h @ params["wmu"] + params["bmu"]
    sigma = jnp.exp(0.5 * (h @ params["wsig"] + params["bsig"]))
    return mu, sigma


if __name__ == "__main__":
    # Small shapes consistent with the module: shape=(C,H,W)=(1,16,16) -> in_dim=256
    C, H, W = 1, 16, 16
    in_dim = C * H * W
    hidden_dim = 128
    latent_dim = 32
    N = 64

    key = jax.random.PRNGKey(0)
    kx, km, ks, kp = jax.random.split(key, 4)

    x = jax.random.normal(kx, (N, C, H, W), jnp.float32)
    mean = 0.1 * jax.random.normal(km, (C, H, W), jnp.float32)
    std = 1.0 + 0.1 * jax.random.uniform(ks, (C, H, W), jnp.float32)
    params = init_params(kp, in_dim, hidden_dim, latent_dim)

    # One-time prep (norm fold, head fusion, bf16 cast) — hoisted out of forward.
    encoder = make_signal_encoder(params, mean, std, latent_dim=latent_dim)

    mu, sigma = encoder(x)
    jax.block_until_ready((mu, sigma))

    mu_ref, sigma_ref = reference_forward(x, mean, std, params)
    assert mu.shape == mu_ref.shape and sigma.shape == sigma_ref.shape
    # bf16 matmul operands (f32 accumulation) -> loosened tolerance vs f32 ref.
    assert jnp.allclose(mu, mu_ref, atol=5e-2, rtol=5e-2)
    assert jnp.allclose(sigma, sigma_ref, atol=5e-2, rtol=5e-2)

    print("KERNEL_OK")
</pallas_src>

<mosaic_0001>
module attributes {stable_mosaic.version = 11 : i64} {
  func.func @k(%arg0: i32, %arg1: memref<8x128xf32, #tpu.memory_space<vmem>>, %arg2: memref<8x128xf32, #tpu.memory_space<vmem>>) attributes {dimension_semantics = [#tpu.dimension_semantics<arbitrary>], iteration_bounds = array<i64: 1>, scalar_prefetch = 0 : i64, scratch_operands = 0 : i64, tpu.core_type = #tpu.core_type<tc>, window_params = [{pipeline_mode = #tpu.pipeline_mode<synchronous>, transform_indices = @transform_0, window_bounds = array<i64: 8, 128>}, {pipeline_mode = #tpu.pipeline_mode<synchronous>, transform_indices = @transform_1, window_bounds = array<i64: 8, 128>}]} {
    %c0 = arith.constant 0 : index
    %c0_0 = arith.constant 0 : index
    %0 = vector.load %arg1[%c0, %c0_0] : memref<8x128xf32, #tpu.memory_space<vmem>>, vector<8x128xf32>
    %c0_1 = arith.constant 0 : index
    %c0_2 = arith.constant 0 : index
    %1 = vector.load %arg2[%c0_1, %c0_2] : memref<8x128xf32, #tpu.memory_space<vmem>>, vector<8x128xf32>
    tpu.vector_store %arg2[%c0_1, %c0_2], %0 {strides = array<i32>} : memref<8x128xf32, #tpu.memory_space<vmem>>, vector<8x128xf32>,
    return
  }
  func.func @transform_0(%arg0: i32) -> (i32, i32) {
    %c0_i32 = arith.constant 0 : i32
    %c0_i32_0 = arith.constant 0 : i32
    %c0_i32_1 = arith.constant 0 : i32
    return %c0_i32, %c0_i32_0 : i32, i32
  }
  func.func @transform_1(%arg0: i32) -> (i32, i32) {
    %c0_i32 = arith.constant 0 : i32
    %c0_i32_0 = arith.constant 0 : i32
    %c0_i32_1 = arith.constant 0 : i32
    return %c0_i32, %c0_i32_0 : i32, i32
  }
}

module attributes {stable_mosaic.version = 11 : i64} {
  func.func @signal_encoder_kernel(%arg0: i32, %arg1: memref<64x256xbf16, #tpu.memory_space<vmem>>, %arg2: memref<256x128xbf16, #tpu.memory_space<vmem>>, %arg3: memref<1x128xf32, #tpu.memory_space<vmem>>, %arg4: memref<128x128xbf16, #tpu.memory_space<vmem>>, %arg5: memref<1x128xf32, #tpu.memory_space<vmem>>, %arg6: memref<128x128xbf16, #tpu.memory_space<vmem>>, %arg7: memref<1x128xf32, #tpu.memory_space<vmem>>, %arg8: memref<1x128xf32, #tpu.memory_space<vmem>>, %arg9: memref<64x128xf32, #tpu.memory_space<vmem>>) attributes {dimension_semantics = [#tpu.dimension_semantics<parallel>], iteration_bounds = array<i64: 1>, scalar_prefetch = 0 : i64, scratch_operands = 0 : i64, tpu.core_type = #tpu.core_type<tc>, window_params = [{transform_indices = @transform_0, window_bounds = array<i64: 64, 256>}, {pipeline_mode = #tpu.pipeline_mode<synchronous>, transform_indices = @transform_1, window_bounds = array<i64: 256, 128>}, {pipeline_mode = #tpu.pipeline_mode<synchronous>, transform_indices = @transform_2, window_bounds = array<i64: 1, 128>}, {pipeline_mode = #tpu.pipeline_mode<synchronous>, transform_indices = @transform_3, window_bounds = array<i64: 128, 128>}, {pipeline_mode = #tpu.pipeline_mode<synchronous>, transform_indices = @transform_4, window_bounds = array<i64: 1, 128>}, {pipeline_mode = #tpu.pipeline_mode<synchronous>, transform_indices = @transform_5, window_bounds = array<i64: 128, 128>}, {pipeline_mode = #tpu.pipeline_mode<synchronous>, transform_indices = @transform_6, window_bounds = array<i64: 1, 128>}, {pipeline_mode = #tpu.pipeline_mode<synchronous>, transform_indices = @transform_7, window_bounds = array<i64: 1, 128>}, {transform_indices = @transform_8, window_bounds = array<i64: 64, 128>}]} {
    %c0 = arith.constant 0 : index
    %c0_0 = arith.constant 0 : index
    %0 = vector.load %arg1[%c0, %c0_0] : memref<64x256xbf16, #tpu.memory_space<vmem>>, vector<64x256xbf16>
    %c0_1 = arith.constant 0 : index
    %c0_2 = arith.constant 0 : index
    %1 = vector.load %arg2[%c0_1, %c0_2] : memref<256x128xbf16, #tpu.memory_space<vmem>>, vector<256x128xbf16>
    %cst = arith.constant dense<0.000000e+00> : vector<64x128xf32>
    %2 = tpu.matmul %0, %1, %cst {dimension_numbers = #tpu.dot_dimension_numbers<[1], [0], [0], [1], [0, 0, 1, 1], [], []>} : vector<64x256xbf16>, vector<256x128xbf16>, vector<64x128xf32> -> vector<64x128xf32>
    %c0_3 = arith.constant 0 : index
    %c0_4 = arith.constant 0 : index
    %3 = vector.load %arg3[%c0_3, %c0_4] : memref<1x128xf32, #tpu.memory_space<vmem>>, vector<1x128xf32>
    %4 = vector.broadcast %3 : vector<1x128xf32> to vector<64x128xf32>
    %5 = arith.addf %2, %4 : vector<64x128xf32>
    %cst_5 = arith.constant 0.000000e+00 : f32
    %6 = vector.broadcast %cst_5 : f32 to vector<64x128xf32>
    %7 = arith.maximumf %5, %6 : vector<64x128xf32>
    %8 = arith.truncf %7 : vector<64x128xf32> to vector<64x128xbf16>
    %c0_6 = arith.constant 0 : index
    %c0_7 = arith.constant 0 : index
    %9 = vector.load %arg4[%c0_6, %c0_7] : memref<128x128xbf16, #tpu.memory_space<vmem>>, vector<128x128xbf16>
    %cst_8 = arith.constant dense<0.000000e+00> : vector<64x128xf32>
    %10 = tpu.matmul %8, %9, %cst_8 {dimension_numbers = #tpu.dot_dimension_numbers<[1], [0], [0], [1], [0, 0, 1, 1], [], []>} : vector<64x128xbf16>, vector<128x128xbf16>, vector<64x128xf32> -> vector<64x128xf32>
    %c0_9 = arith.constant 0 : index
    %c0_10 = arith.constant 0 : index
    %11 = vector.load %arg5[%c0_9, %c0_10] : memref<1x128xf32, #tpu.memory_space<vmem>>, vector<1x128xf32>
    %12 = vector.broadcast %11 : vector<1x128xf32> to vector<64x128xf32>
    %13 = arith.addf %10, %12 : vector<64x128xf32>
    %cst_11 = arith.constant 0.000000e+00 : f32
    %14 = vector.broadcast %cst_11 : f32 to vector<64x128xf32>
    %15 = arith.maximumf %13, %14 : vector<64x128xf32>
    %16 = arith.truncf %15 : vector<64x128xf32> to vector<64x128xbf16>
    %c0_12 = arith.constant 0 : index
    %c0_13 = arith.constant 0 : index
    %17 = vector.load %arg6[%c0_12, %c0_13] : memref<128x128xbf16, #tpu.memory_space<vmem>>, vector<128x128xbf16>
    %cst_14 = arith.constant dense<0.000000e+00> : vector<64x128xf32>
    %18 = tpu.matmul %16, %17, %cst_14 {dimension_numbers = #tpu.dot_dimension_numbers<[1], [0], [0], [1], [0, 0, 1, 1], [], []>} : vector<64x128xbf16>, vector<128x128xbf16>, vector<64x128xf32> -> vector<64x128xf32>
    %c0_15 = arith.constant 0 : index
    %c0_16 = arith.constant 0 : index
    %19 = vector.load %arg7[%c0_15, %c0_16] : memref<1x128xf32, #tpu.memory_space<vmem>>, vector<1x128xf32>
    %20 = vector.broadcast %19 : vector<1x128xf32> to vector<64x128xf32>
    %21 = arith.addf %18, %20 : vector<64x128xf32>
    %c0_17 = arith.constant 0 : index
    %c0_18 = arith.constant 0 : index
    %22 = vector.load %arg8[%c0_17, %c0_18] : memref<1x128xf32, #tpu.memory_space<vmem>>, vector<1x128xf32>
    %cst_19 = arith.constant 0.000000e+00 : f32
    %23 = vector.broadcast %cst_19 : f32 to vector<1x128xf32>
    %24 = arith.cmpf one, %22, %23 : vector<1x128xf32>
    %25 = math.exp %21 : vector<64x128xf32>
    %26 = vector.shape_cast %24 : vector<1x128xi1> to vector<1x128xi1>
    %27 = vector.broadcast %26 : vector<1x128xi1> to vector<64x128xi1>
    %28 = arith.select %27, %25, %21 : vector<64x128xi1>, vector<64x128xf32>
    %c0_20 = arith.constant 0 : index
    %c0_21 = arith.constant 0 : index
    %29 = vector.load %arg9[%c0_20, %c0_21] : memref<64x128xf32, #tpu.memory_space<vmem>>, vector<64x128xf32>
    tpu.vector_store %arg9[%c0_20, %c0_21], %28 {strides = array<i32>} : memref<64x128xf32, #tpu.memory_space<vmem>>, vector<64x128xf32>,
    return
  }
  func.func @transform_0(%arg0: i32) -> (i32, i32) {
    %c0_i32 = arith.constant 0 : i32
    %c0_i32_0 = arith.constant 0 : i32
    return %arg0, %c0_i32 : i32, i32
  }
  func.func @transform_1(%arg0: i32) -> (i32, i32) {
    %c0_i32 = arith.constant 0 : i32
    %c0_i32_0 = arith.constant 0 : i32
    %c0_i32_1 = arith.constant 0 : i32
    return %c0_i32, %c0_i32_0 : i32, i32
  }
  func.func @transform_2(%arg0: i32) -> (i32, i32) {
    %c0_i32 = arith.constant 0 : i32
    %c0_i32_0 = arith.constant 0 : i32
    %c0_i32_1 = arith.constant 0 : i32
    return %c0_i32, %c0_i32_0 : i32, i32
  }
  func.func @transform_3(%arg0: i32) -> (i32, i32) {
    %c0_i32 = arith.constant 0 : i32
    %c0_i32_0 = arith.constant 0 : i32
    %c0_i32_1 = arith.constant 0 : i32
    return %c0_i32, %c0_i32_0 : i32, i32
  }
  func.func @transform_4(%arg0: i32) -> (i32, i32) {
    %c0_i32 = arith.constant 0 : i32
    %c0_i32_0 = arith.constant 0 : i32
    %c0_i32_1 = arith.constant 0 : i32
    return %c0_i32, %c0_i32_0 : i32, i32
  }
  func.func @transform_5(%arg0: i32) -> (i32, i32) {
    %c0_i32 = arith.constant 0 : i32
    %c0_i32_0 = arith.constant 0 : i32
    %c0_i32_1 = arith.constant 0 : i32
    return %c0_i32, %c0_i32_0 : i32, i32
  }
  func.func @transform_6(%arg0: i32) -> (i32, i32) {
    %c0_i32 = arith.constant 0 : i32
    %c0_i32_0 = arith.constant 0 : i32
    %c0_i32_1 = arith.constant 0 : i32
    return %c0_i32, %c0_i32_0 : i32, i32
  }
  func.func @transform_7(%arg0: i32) -> (i32, i32) {
    %c0_i32 = arith.constant 0 : i32
    %c0_i32_0 = arith.constant 0 : i32
    %c0_i32_1 = arith.constant 0 : i32
    return %c0_i32, %c0_i32_0 : i32, i32
  }
  func.func @transform_8(%arg0: i32) -> (i32, i32) {
    %c0_i32 = arith.constant 0 : i32
    %c0_i32_0 = arith.constant 0 : i32
    return %arg0, %c0_i32 : i32, i32
  }
}

</mosaic_0001>

<bundles_post_ra>
// kernel: tpu_custom_call.1
= control target key start
LH: loop header
LB: loop body
LE: loop exit
PB: predicated region body
PF: predicated region fallthrough
CT: control target
= control target key end

     0   :  { %6 = vsyncpa [#allocation3], 0  ;;  %s102_s0 = inlined_call_operand.hbm [shape: f32[8,128], index: 0, kind: input, shape index: {}]   ;;  %s103_s1 = inlined_call_operand.hbm [shape: f32[8,128], index: 1, kind: output, shape index: {}]  }
   0x1   :  { %7 = vsyncpa [#allocation4], 0  ;;  %s84_s6 = smov [#allocation2]  }
   0x2   :  { %s14_s7 = sshll.u32 %s84_s6, 4  ;;  %s15_s7 = int_to_ptr.vmem [resolvable:$true] %s14_s7 }
   0x3   :  { %s48_s8 = scalar_lea.vmem %s15_s7, 128  ;;  %p53_p1 = scmp.lt.s32.totalorder %s15_s7, %s15_s7 }
   0x4   :  { %p49_p0 = scmp.ne.s32.totalorder %s15_s7, %s48_s8  ;;  %p54_p2 = scmp.lt.s32.totalorder %s48_s8, %s48_s8 }
   0x6   :  { %p55_p3 = por %p54_p2, %p53_p1 }
   0x8   :  { %p56_p4 = pnand %p55_p3, %p49_p0 }
   0xa   :  { %59 = shalt.err (!%p56_p4)
}
   0xb   :  { %17 = dma.hbm_to_vmem [thread:$0]  %s102_s0, 128, %s15_s7, [#allocation3]  }
   0xc   :  { %80 = dma.done.wait [#allocation3], 128  }
   0xd   :  { %81 = vsyncadd [#allocation3], 4294967168  ;;  %s85_s11 = smov [#allocation5]   ;;  %v21_v0 = vld [vmem:[#allocation2] sm:$0xff] }
   0xe   :  { %s29_s12 = sshll.u32 %s85_s11, 4  ;;  %22 = vst [vmem:[#allocation5] sm:$0xff] %v21_v0  ;;  %s30_s12 = int_to_ptr.vmem [resolvable:$true] %s29_s12 }
   0xf   :  { %s60_s13 = scalar_lea.vmem %s30_s12, 128  ;;  %p65_p6 = scmp.lt.s32.totalorder %s30_s12, %s30_s12 }
  0x10   :  { %p61_p5 = scmp.ne.s32.totalorder %s30_s12, %s60_s13  ;;  %p66_p7 = scmp.lt.s32.totalorder %s60_s13, %s60_s13 }
  0x12   :  { %p67_p8 = por %p66_p7, %p65_p6 }
  0x14   :  { %p68_p9 = pnand %p67_p8, %p61_p5 }
  0x16   :  { %71 = shalt.err (!%p68_p9)
}
  0x17   :  { %32 = dma.vmem_to_hbm [thread:$0]  %s30_s12, 128, %s103_s1, [#allocation4]  }
  0x18   :  { %82 = dma.done.wait [#allocation4], 128  }
  0x19   :  { %83 = vsyncadd [#allocation4], 4294967168 }
  0x1a   :  { %36 = vsyncpa [#allocation3], 1 }
  0x1b   :  { %37 = vsyncpa [#allocation4], 1 }

// kernel: forward.1
= control target key start
LH: loop header
LB: loop body
LE: loop exit
PB: predicated region body
PF: predicated region fallthrough
CT: control target
= control target key end

     0   :  { %s1060_s1 = inlined_call_operand.vmem [shape: bf16[256,128], index: 1, kind: input, shape index: {}]   ;;  %s1061_s0 = inlined_call_operand.vmem [shape: bf16[64,256], index: 0, kind: input, shape index: {}]   ;;  %s1062_s3 = inlined_call_operand.vmem [shape: bf16[128,128], index: 3, kind: input, shape index: {}]   ;;  %s1063_s5 = inlined_call_operand.vmem [shape: bf16[128,128], index: 5, kind: input, shape index: {}]   ;;  %s1064_s2 = inlined_call_operand.vmem [shape: f32[1,128], index: 2, kind: input, shape index: {}]   ;;  %s1065_s4 = inlined_call_operand.vmem [shape: f32[1,128], index: 4, kind: input, shape index: {}]   ;;  %s1066_s6 = inlined_call_operand.vmem [shape: f32[1,128], index: 6, kind: input, shape index: {}]   ;;  %s1067_s7 = inlined_call_operand.vmem [shape: f32[1,128], index: 7, kind: input, shape index: {}]   ;;  %s1068_s8 = inlined_call_operand.vmem [shape: f32[64,128], index: 8, kind: output, shape index: {}]  }
   0x1   :  { %v790_v0 = vld [vmem:[%s1060_s1 + $0x78] sm:$0xff]   ;;  %v792_v2 = vld [vmem:[%s1060_s1 + $0x70] sm:$0xff]   ;;  %v794_v4 = vld [vmem:[%s1060_s1 + $0x68] sm:$0xff]  }
   0x2   :  { %v791_v1 = vld [vmem:[%s1060_s1 + $0x38] sm:$0xff]   ;;  %661 = vmatprep.subr.bf16.mxu0 %v790_v0  ;;  %v793_v3 = vld [vmem:[%s1060_s1 + $0x30] sm:$0xff]   ;;  %v795_v5 = vld [vmem:[%s1060_s1 + $0x28] sm:$0xff]  }
   0x3   :  { %662 = vmatpush3.bf16.msra.mxu0 %v791_v1  ;;  %v796_v6 = vld [vmem:[%s1060_s1 + $0x60] sm:$0xff]   ;;  %v798_v8 = vld [vmem:[%s1060_s1 + $0x58] sm:$0xff]   ;;  %v800_v10 = vld [vmem:[%s1060_s1 + $0x50] sm:$0xff]  }
   0x4   :  { %663 = vmatprep.subr.bf16.mxu0 %v792_v2  ;;  %v797_v7 = vld [vmem:[%s1060_s1 + $0x20] sm:$0xff]   ;;  %v799_v9 = vld [vmem:[%s1060_s1 + $0x18] sm:$0xff]   ;;  %v801_v12 = vld [vmem:[%s1060_s1 + $0x10] sm:$0xff]  }
   0x5   :  { %v808_v11 = vld [vmem:[%s1061_s0 + $0x4] ss:$8 sps:$4 sm:$0xff]   ;;  %v818_v16 = vld [vmem:[%s1062_s3 + $0x38] sm:$0xff]   ;;  %v819_v17 = vld [vmem:[%s1062_s3 + $0x30] sm:$0xff]  }
   0x6   :  { %245 = vmatprep.mubr.bf16.mxu0 %v808_v11  ;;  %v802_v13 = vld [vmem:[%s1060_s1 + $0x48] sm:$0xff]   ;;  %v804_v15 = vld [vmem:[%s1060_s1 + $0x40] sm:$0xff]   ;;  %725 = vmatprep.subr.bf16.mxu1 %v818_v16  ;;  %v809_v21 = vld [vmem:[%s1061_s0 + $0x14] ss:$8 sps:$4 sm:$0xff]  }
   0x7   :  { %664 = vmatpush3.bf16.msra.mxu0 %v793_v3  ;;  %v803_v14 = vld [vmem:[%s1060_s1 + $0x8] sm:$0xff]   ;;  %726 = vmatpush3.bf16.msra.mxu1 %v818_v16  ;;  %v805_v19 = vld [vmem:[%s1060_s1] sm:$0xff]   ;;  %v811_v22 = vld [vmem:[%s1061_s0 + $0x10] ss:$8 sps:$4 sm:$0xff]  }
   0x8   :  { %665 = vmatprep.subr.bf16.mxu0 %v794_v4  ;;  %v820_v18 = vld [vmem:[%s1062_s3 + $0x28] sm:$0xff]   ;;  %727 = vmatprep.subr.bf16.mxu1 %v819_v17  ;;  %v815_v25 = vld [vmem:[%s1061_s0 + $0x34] ss:$8 sps:$4 sm:$0xff]   ;;  %v817_v26 = vld [vmem:[%s1061_s0 + $0x30] ss:$8 sps:$4 sm:$0xff]  }
   0x9   :  { %v806_v20 = vld [vmem:[%s1061_s0] ss:$8 sps:$4 sm:$0xff]   ;;  %v812_v23 = vld [vmem:[%s1061_s0 + $0x24] ss:$8 sps:$4 sm:$0xff]   ;;  %v822_v28 = vld [vmem:[%s1062_s3 + $0x18] sm:$0xff]  }
   0xa   :  { %v814_v24 = vld [vmem:[%s1061_s0 + $0x20] ss:$8 sps:$4 sm:$0xff]   ;;  %v823_v29 = vld [vmem:[%s1062_s3 + $0x10] sm:$0xff]   ;;  %v826_v32 = vld [vmem:[%s1063_s5 + $0x38] sm:$0xff]  }
   0xb   :  { %666 = vmatpush3.bf16.msra.mxu0 %v795_v5  ;;  %728 = vmatpush3.bf16.msra.mxu1 %v819_v17  ;;  %v821_v27 = vld [vmem:[%s1062_s3 + $0x20] sm:$0xff]   ;;  %v824_v30 = vld [vmem:[%s1062_s3 + $0x8] sm:$0xff]   ;;  %v827_v33 = vld [vmem:[%s1063_s5 + $0x30] sm:$0xff]  }
   0xc   :  { %667 = vmatprep.subr.bf16.mxu0 %v796_v6  ;;  %729 = vmatprep.subr.bf16.mxu1 %v820_v18  ;;  %v825_v31 = vld [vmem:[%s1062_s3] sm:$0xff]   ;;  %v828_v34 = vld [vmem:[%s1063_s5 + $0x28] sm:$0xff]   ;;  %v830_v36 = vld [vmem:[%s1063_s5 + $0x18] sm:$0xff]  }
   0xd   :  { %v829_v35 = vld [vmem:[%s1063_s5 + $0x20] sm:$0xff]  }
   0xe   :  { %v618_v41 = vld [vmem:[%s1064_s2] ss:$0 sm:$0xff] }
   0xf   :  { %668 = vmatpush3.bf16.msra.mxu0 %v797_v7  ;;  %730 = vmatpush3.bf16.msra.mxu1 %v820_v18  ;;  %v831_v18 = vld [vmem:[%s1063_s5 + $0x10] sm:$0xff]  }
  0x10   :  { %669 = vmatprep.subr.bf16.mxu0 %v798_v8  ;;  %731 = vmatprep.subr.bf16.mxu1 %v821_v27 }
  0x13   :  { %670 = vmatpush3.bf16.msra.mxu0 %v799_v9  ;;  %732 = vmatpush3.bf16.msra.mxu1 %v821_v27 }
  0x14   :  { %671 = vmatprep.subr.bf16.mxu0 %v800_v10  ;;  %733 = vmatprep.subr.bf16.mxu1 %v822_v28 }
  0x17   :  { %672 = vmatpush3.bf16.msra.mxu0 %v801_v12  ;;  %734 = vmatpush3.bf16.msra.mxu1 %v822_v28 }
  0x18   :  { %673 = vmatprep.subr.bf16.mxu0 %v802_v13  ;;  %735 = vmatprep.subr.bf16.mxu1 %v823_v29 }
  0x1b   :  { %674 = vmatpush3.bf16.msra.mxu0 %v803_v14  ;;  %736 = vmatpush3.bf16.msra.mxu1 %v823_v29 }
  0x1c   :  { %675 = vmatprep.subr.bf16.mxu0 %v804_v15  ;;  %737 = vmatprep.subr.bf16.mxu1 %v824_v30 }
  0x1f   :  { %676 = vmatpush3.bf16.msra.mxu0 %v805_v19  ;;  %738 = vmatpush3.bf16.msra.mxu1 %v824_v30  ;;  %v832_v19 = vld [vmem:[%s1063_s5 + $0x8] sm:$0xff]  }
  0x20   :  { %739 = vmatprep.subr.bf16.mxu1 %v825_v31  ;;  %749 = vmatprep.subr.bf16.mxu0 %v826_v32 }
  0x22   :  { %246 = vmatmul.mubr.bf16.vlgmr.msra.gmra.mxu0 %v806_v20  ;;  %v833_v20 = vld [vmem:[%s1063_s5] sm:$0xff]  }
  0x23   :  { %253 = vmatprep.mubr.bf16.mxu0 %v809_v21  ;;  %740 = vmatpush3.bf16.msra.mxu1 %v825_v31 }
  0x24   :  { %773 = vmatprep.subr.bf16.mxu1 %v826_v32  ;;  %750 = vmatpush3.bf16.msra.mxu0 %v826_v32 }
  0x25   :  { %751 = vmatprep.subr.bf16.mxu0 %v827_v33 }
  0x28   :  { %752 = vmatpush3.bf16.msra.mxu0 %v827_v33 }
  0x29   :  { %753 = vmatprep.subr.bf16.mxu0 %v828_v34 }
  0x2a   :  { %254 = vmatmul.mubr.bf16.gmra.mxu0 %v811_v22 }
  0x2b   :  { %261 = vmatprep.mubr.bf16.mxu0 %v812_v23  ;;  %v643_v23 = vld [vmem:[%s1065_s4] ss:$0 sm:$0xff] }
  0x2c   :  { %754 = vmatpush3.bf16.msra.mxu0 %v828_v34 }
  0x2d   :  { %755 = vmatprep.subr.bf16.mxu0 %v829_v35 }
  0x30   :  { %756 = vmatpush3.bf16.msra.mxu0 %v829_v35 }
  0x31   :  { %757 = vmatprep.subr.bf16.mxu0 %v830_v36 }
  0x32   :  { %262 = vmatmul.mubr.bf16.gmra.mxu0 %v814_v24 }
  0x33   :  { %269 = vmatprep.mubr.bf16.mxu0 %v815_v25 }
  0x34   :  { %758 = vmatpush3.bf16.msra.mxu0 %v830_v36 }
  0x35   :  { %759 = vmatprep.subr.bf16.mxu0 %v831_v18 }
  0x38   :  { %760 = vmatpush3.bf16.msra.mxu0 %v831_v18 }
  0x39   :  { %761 = vmatprep.subr.bf16.mxu0 %v832_v19 }
  0x3a   :  { %270 = vmatmul.mubr.bf16.gmra.mxu0 %v817_v26 }
  0x3c   :  { %762 = vmatpush3.bf16.msra.mxu0 %v832_v19 }
  0x3d   :  { %763 = vmatprep.subr.bf16.mxu0 %v833_v20 }
  0x40   :  { %764 = vmatpush3.bf16.msra.mxu0 %v833_v20 }
  0xe2   :  { %v677_v37 = vpop.f32.mrf.mxu0 }
  0xe4   :  { %v678_v38 = vpop.f32.mrf.mxu0 }
  0xe5   :  { %v679_v39 = vadd.f32 %v678_v38, %v677_v37 }
  0xe6   :  { %v680_v40 = vpop.f32.mrf.mxu0 }
  0xe7   :  { %v248_v44 = vadd.f32 %v679_v39, %v618_v41 }
  0xe8   :  { %v681_v42 = vpop.f32.mrf.mxu0 }
  0xe9   :  { %v682_v43 = vadd.f32 %v681_v42, %v680_v40  ;;  %v278_v49 = vmax.f32 %v248_v44, 0.0 }
  0xea   :  { %v683_v45 = vpop.f32.mrf.mxu0 }
  0xeb   :  { %v251_v46 = vadd.f32 %v682_v43, %v618_v41 }
  0xec   :  { %v684_v47 = vpop.f32.mrf.mxu0 }
  0xed   :  { %v685_v48 = vadd.f32 %v684_v47, %v683_v45  ;;  %v279_v50 = vmax.f32 %v251_v46, 0.0 }
  0xee   :  { %v686_v51 = vpop.f32.mrf.mxu0 }
  0xef   :  { %v286_v52 = vpack.c.bf16 %v279_v50, %v278_v49  ;;  %v256_v54 = vadd.f32 %v685_v48, %v618_v41  ;;  %v652_v50 = vld [vmem:[%s1066_s6] ss:$0 sm:$0xff] }
  0xf0   :  { %v687_v53 = vpop.f32.mrf.mxu0 }
  0xf1   :  { %v688_v55 = vadd.f32 %v687_v53, %v686_v51  ;;  %741 = vmatprep.mubr.bf16.mxu1 %v286_v52  ;;  %v280_v59 = vmax.f32 %v256_v54, 0.0  ;;  %v593_v52 = vlaneseq }
  0xf2   :  { %v689_v56 = vpop.f32.mrf.mxu0 }
  0xf3   :  { %v259_v57 = vadd.f32 %v688_v55, %v618_v41  ;;  %v574_v55 = vld [vmem:[%s1067_s7] sm:$0x1] }
  0xf4   :  { %v690_v58 = vpop.f32.mrf.mxu0  ;;  %vm575_vm0 = vcmp.ne.f32.partialorder %v574_v55, 0.0 }
  0xf5   :  { %v281_v60 = vmax.f32 %v259_v57, 0.0  ;;  %v691_v61 = vadd.f32 %v690_v58, %v689_v56  ;;  %v594_v58 = vshrl.u32 %v593_v52, 7 }
  0xf6   :  { %v692_v62 = vpop.f32.mrf.mxu0 }
  0xf7   :  { %v287_v63 = vpack.c.bf16 %v281_v60, %v280_v59  ;;  %v264_v1 = vadd.f32 %v691_v61, %v618_v41 }
  0xf8   :  { %v693_v0 = vpop.f32.mrf.mxu0 }
  0xf9   :  { %v694_v2 = vadd.f32 %v693_v0, %v692_v62  ;;  %742 = vmatmul.mubr.bf16.vlgmr.msra.gmra.mxu1 %v287_v63  ;;  %v282_v6 = vmax.f32 %v264_v1, 0.0  ;;  %v595_v1 = vsub.s32 0, %v594_v58 }
  0xfa   :  { %v695_v3 = vpop.f32.mrf.mxu0  ;;  %781 = vmatpush3.bf16.msra.mxu1 %v826_v32 }
  0xfb   :  { %v267_v4 = vadd.f32 %v694_v2, %v618_v41  ;;  %774 = vmatprep.subr.bf16.mxu1 %v827_v33  ;;  %v850_v2 = vmov 0  }
  0xfc   :  { %v696_v5 = vpop.f32.mrf.mxu0 }
  0xfd   :  { %v283_v7 = vmax.f32 %v267_v4, 0.0  ;;  %v697_v8 = vadd.f32 %v696_v5, %v695_v3  ;;  %v592_v3 = vsel %vm575_vm0, 1, %v850_v2 }
  0xfe   :  { %v698_v9 = vpop.f32.mrf.mxu0  ;;  %782 = vmatpush3.bf16.msra.mxu1 %v827_v33  ;;  %v596_v5 = vrot.slane %v592_v3, %v595_v1 }
  0xff   :  { %v288_v10 = vpack.c.bf16 %v283_v7, %v282_v6  ;;  %775 = vmatprep.subr.bf16.mxu1 %v828_v34  ;;  %v272_v12 = vadd.f32 %v697_v8, %v618_v41 }
 0x100   :  { %v699_v11 = vpop.f32.mrf.mxu0  ;;  %vm597_vm1 = vcmp.eq.s32.totalorder %v596_v5, 1 }
 0x101   :  { %v700_v13 = vadd.f32 %v699_v11, %v698_v9  ;;  %745 = vmatprep.mubr.bf16.mxu1 %v288_v10  ;;  %v284_v15 = vmax.f32 %v272_v12, 0.0 }
 0x102   :  { %783 = vmatpush3.bf16.msra.mxu1 %v828_v34 }
 0x103   :  { %v275_v14 = vadd.f32 %v700_v13, %v618_v41  ;;  %776 = vmatprep.subr.bf16.mxu1 %v829_v35 }
 0x105   :  { %v285_v16 = vmax.f32 %v275_v14, 0.0 }
 0x106   :  { %784 = vmatpush3.bf16.msra.mxu1 %v829_v35 }
 0x107   :  { %v289_v17 = vpack.c.bf16 %v285_v16, %v284_v15  ;;  %777 = vmatprep.subr.bf16.mxu1 %v830_v36 }
 0x109   :  { %746 = vmatmul.mubr.bf16.gmra.mxu1 %v289_v17 }
 0x10a   :  { %785 = vmatpush3.bf16.msra.mxu1 %v830_v36 }
 0x10b   :  { %778 = vmatprep.subr.bf16.mxu1 %v831_v18 }
 0x10e   :  { %786 = vmatpush3.bf16.msra.mxu1 %v831_v18 }
 0x10f   :  { %779 = vmatprep.subr.bf16.mxu1 %v832_v19 }
 0x112   :  { %787 = vmatpush3.bf16.msra.mxu1 %v832_v19 }
 0x113   :  { %780 = vmatprep.subr.bf16.mxu1 %v833_v20 }
 0x116   :  { %788 = vmatpush3.bf16.msra.mxu1 %v833_v20 }
 0x1b9   :  { %v743_v21 = vpop.f32.mrf.mxu1 }
 0x1ba   :  { %v404_v27 = vadd.f32 %v743_v21, %v643_v23 }
 0x1bb   :  { %v395_v22 = vpop.f32.mrf.mxu1 }
 0x1bc   :  { %v396_v25 = vadd.f32 %v643_v23, %v395_v22  ;;  %v428_v33 = vmax.f32 %v404_v27, 0.0 }
 0x1bd   :  { %v744_v24 = vpop.f32.mrf.mxu1 }
 0x1be   :  { %v407_v26 = vadd.f32 %v744_v24, %v643_v23  ;;  %v426_v31 = vmax.f32 %v396_v25, 0.0 }
 0x1bf   :  { %v398_v28 = vpop.f32.mrf.mxu1 }
 0x1c0   :  { %v399_v29 = vadd.f32 %v643_v23, %v398_v28  ;;  %v429_v30 = vmax.f32 %v407_v26, 0.0 }
 0x1c2   :  { %v427_v32 = vmax.f32 %v399_v29, 0.0  ;;  %v435_v35 = vpack.c.bf16 %v429_v30, %v428_v33 }
 0x1c4   :  { %v434_v34 = vpack.c.bf16 %v427_v32, %v426_v31 }
 0x1c6   :  { %765 = vmatprep.mubr.bf16.mxu0 %v434_v34 }
 0x1c7   :  { %766 = vmatmul.mubr.bf16.vlgmr.msra.gmra.mxu0 %v435_v35 }
 0x1c9   :  { %v747_v36 = vpop.f32.mrf.mxu1 }
 0x1ca   :  { %v420_v41 = vadd.f32 %v747_v36, %v643_v23 }
 0x1cb   :  { %v411_v37 = vpop.f32.mrf.mxu1 }
 0x1cc   :  { %v412_v39 = vadd.f32 %v643_v23, %v411_v37  ;;  %v432_v47 = vmax.f32 %v420_v41, 0.0 }
 0x1cd   :  { %v748_v38 = vpop.f32.mrf.mxu1 }
 0x1ce   :  { %v423_v40 = vadd.f32 %v748_v38, %v643_v23  ;;  %v430_v45 = vmax.f32 %v412_v39, 0.0 }
 0x1cf   :  { %v414_v42 = vpop.f32.mrf.mxu1 }
 0x1d0   :  { %v415_v43 = vadd.f32 %v643_v23, %v414_v42  ;;  %v433_v44 = vmax.f32 %v423_v40, 0.0 }
 0x1d2   :  { %v431_v46 = vmax.f32 %v415_v43, 0.0  ;;  %v437_v49 = vpack.c.bf16 %v433_v44, %v432_v47 }
 0x1d4   :  { %v436_v48 = vpack.c.bf16 %v431_v46, %v430_v45 }
 0x1d6   :  { %769 = vmatprep.mubr.bf16.mxu1 %v436_v48 }
 0x1d7   :  { %770 = vmatmul.mubr.bf16.vlgmr.msra.gmra.mxu1 %v437_v49 }
 0x287   :  { %v767_v51 = vpop.f32.mrf.mxu0 }
 0x288   :  { %v552_v53 = vadd.f32 %v767_v51, %v652_v50 }
 0x289   :  { %v543_v54 = vpop.f32.mrf.mxu0 }
 0x28a   :  { %v580_v56 = vmul.f32 1.442695, %v552_v53  ;;  %v544_v57 = vadd.f32 %v652_v50, %v543_v54 }
 0x28b   :  { %v768_v59 = vpop.f32.mrf.mxu0 }
 0x28c   :  { %834 = vpow2.f32 %v580_v56  ;;  %v576_v60 = vmul.f32 1.442695, %v544_v57  ;;  %v555_v61 = vadd.f32 %v768_v59, %v652_v50 }
 0x28d   :  { %v546_v62 = vpop.f32.mrf.mxu0 }
 0x28e   :  { %836 = vpow2.f32 %v576_v60  ;;  %v582_v63 = vmul.f32 1.442695, %v555_v61  ;;  %v547_v0 = vadd.f32 %v652_v50, %v546_v62 }
 0x290   :  { %838 = vpow2.f32 %v582_v63  ;;  %v578_v4 = vmul.f32 1.442695, %v547_v0 }
 0x292   :  { %840 = vpow2.f32 %v578_v4 }
 0x297   :  { %v771_v6 = vpop.f32.mrf.mxu1 }
 0x298   :  { %v568_v7 = vadd.f32 %v771_v6, %v652_v50 }
 0x299   :  { %v835_v8 = vpop.eup %834  ;;  %v559_v9 = vpop.f32.mrf.mxu1 }
 0x29a   :  { %v600_v10 = vsel %vm597_vm1, %v835_v8, %v552_v53  ;;  %v588_v11 = vmul.f32 1.442695, %v568_v7  ;;  %v560_v12 = vadd.f32 %v652_v50, %v559_v9 }
 0x29b   :  { %v837_v13 = vpop.eup %836  ;;  %608 = vst [vmem:[%s1068_s8 + $0x10] sm:$0xff] %v600_v10  ;;  %v772_v14 = vpop.f32.mrf.mxu1 }
 0x29c   :  { %v598_v15 = vsel %vm597_vm1, %v837_v13, %v544_v57  ;;  %842 = vpow2.f32 %v588_v11  ;;  %v584_v16 = vmul.f32 1.442695, %v560_v12  ;;  %v571_v17 = vadd.f32 %v772_v14, %v652_v50 }
 0x29d   :  { %v839_v18 = vpop.eup %838  ;;  %606 = vst [vmem:[%s1068_s8] sm:$0xff] %v598_v15  ;;  %v562_v19 = vpop.f32.mrf.mxu1 }
 0x29e   :  { %v601_v20 = vsel %vm597_vm1, %v839_v18, %v555_v61  ;;  %844 = vpow2.f32 %v584_v16  ;;  %v590_v21 = vmul.f32 1.442695, %v571_v17  ;;  %v563_v22 = vadd.f32 %v652_v50, %v562_v19 }
 0x29f   :  { %v841_v23 = vpop.eup %840  ;;  %609 = vst [vmem:[%s1068_s8 + $0x18] sm:$0xff] %v601_v20 }
 0x2a0   :  { %v599_v24 = vsel %vm597_vm1, %v841_v23, %v547_v0  ;;  %846 = vpow2.f32 %v590_v21  ;;  %v586_v25 = vmul.f32 1.442695, %v563_v22 }
 0x2a1   :  { %607 = vst [vmem:[%s1068_s8 + $0x8] sm:$0xff] %v599_v24 }
 0x2a2   :  { %848 = vpow2.f32 %v586_v25 }
 0x2a9   :  { %v843_v26 = vpop.eup %842 }
 0x2aa   :  { %v604_v27 = vsel %vm597_vm1, %v843_v26, %v568_v7 }
 0x2ab   :  { %v845_v28 = vpop.eup %844  ;;  %612 = vst [vmem:[%s1068_s8 + $0x30] sm:$0xff] %v604_v27 }
 0x2ac   :  { %v602_v29 = vsel %vm597_vm1, %v845_v28, %v560_v12 }
 0x2ad   :  { %v847_v30 = vpop.eup %846  ;;  %610 = vst [vmem:[%s1068_s8 + $0x20] sm:$0xff] %v602_v29 }
 0x2ae   :  { %v605_v31 = vsel %vm597_vm1, %v847_v30, %v571_v17 }
 0x2af   :  { %v849_v32 = vpop.eup %848  ;;  %613 = vst [vmem:[%s1068_s8 + $0x38] sm:$0xff] %v605_v31 }
 0x2b0   :  { %v603_v33 = vsel %vm597_vm1, %v849_v32, %v563_v22 }
 0x2b1   :  { %611 = vst [vmem:[%s1068_s8 + $0x28] sm:$0xff] %v603_v33 }

</bundles_post_ra>
